<compile_context>
chip_gen: v7x
topology: tpu7x:2x2x1
jax: 0.10.0
libtpu: 0.0.40
codegen_flags: <defaults>
</compile_context>

<pallas_src>
import functools

import jax
import jax.numpy as jnp
from jax.experimental import pallas as pl
from jax.experimental.pallas import tpu as pltpu


def _mlp_kernel(n_applied, compute_dtype, *refs):
    """Fused MLP over one batch tile (feature-major layout).

    refs = (x_ref, w0, b0, w1, b1, ..., w_last, b_last, o_ref)
    x_ref: (in_dim, BT), o_ref: (out_dim, BT).
    Weights are PyTorch orientation (out_features, in_features); biases are
    (out_features, 1).  The first n_applied-1 layers get tanh.
    """
    x_ref = refs[0]
    o_ref = refs[-1]
    p = refs[1:-1]
    n_hidden = n_applied - 1

    a = x_ref[...].astype(compute_dtype)             # (in_dim, BT)
    for i in range(n_applied):
        w = p[2 * i][...].astype(compute_dtype)       # (out_i, in_i)
        b = p[2 * i + 1][...]                         # (out_i, 1), f32
        k_in = w.shape[1]
        if k_in <= 4:
            # Tiny contraction: broadcast multiply-adds on the VPU; skip MXU.
            z = b
            for k in range(k_in):
                z = z + (w[:, k:k + 1] * a[k:k + 1, :]).astype(jnp.float32)
        else:
            z = jnp.dot(w, a, preferred_element_type=jnp.float32) + b
        if i < n_hidden:
            a = jnp.tanh(z).astype(compute_dtype)
        else:
            a = z
    o_ref[...] = a.astype(o_ref.dtype)


def fcn_forward(x, params, *, bt=512, compute_dtype=jnp.float32):
    """Forward pass of the FCN.

    x: (batch, in_dim) float array.
    params: list of (W, b) for the *applied* layers, in application order,
            PyTorch orientation (W: (out, in), b: (out,)).  All layers except
            the last get tanh (matches FCN.forward).
    """
    n_applied = len(params)
    batch, in_dim = x.shape
    out_dim = params[-1][0].shape[0]

    # Batch tile: multiple of 128 (lane width).  512 keeps vreg live ranges
    # comfortable for the unrolled layer chain on all of v5e/v6e/v7x.
    bt = max(128, (bt // 128) * 128)
    n_tiles = pl.cdiv(batch, bt)
    if n_tiles == 1:
        bt = 128 * pl.cdiv(batch, 128)   # shrink tile for small batches
    padded = n_tiles * bt

    # Feature-major input: (in_dim, padded_batch); pad extra rows with zeros
    # (their outputs are sliced off below).
    xt = jnp.transpose(x.astype(jnp.float32))
    if padded != batch:
        xt = jnp.pad(xt, ((0, 0), (0, padded - batch)))

    flat_args = [xt]
    in_specs = [pl.BlockSpec((in_dim, bt), lambda i: (0, i))]
    for w, b in params:
        out_f, in_f = w.shape
        flat_args.append(w.astype(jnp.float32))
        in_specs.append(pl.BlockSpec((out_f, in_f), lambda i: (0, 0)))
        flat_args.append(b.reshape(out_f, 1).astype(jnp.float32))
        in_specs.append(pl.BlockSpec((out_f, 1), lambda i: (0, 0)))

    kernel = functools.partial(_mlp_kernel, n_applied, compute_dtype)

    out_t = pl.pallas_call(
        kernel,
        out_shape=jax.ShapeDtypeStruct((out_dim, padded), jnp.float32),
        grid=(n_tiles,),
        in_specs=in_specs,
        out_specs=pl.BlockSpec((out_dim, bt), lambda i: (0, i)),
        compiler_params=pltpu.CompilerParams(
            dimension_semantics=("parallel",)),
    )(*flat_args)

    return jnp.transpose(out_t[:, :batch])            # (batch, out_dim)


def init_fcn_params(layers, key):
    """Xavier-normal weights (gain=1.0), zero biases — same as FCN.__init__.
    Weights in PyTorch orientation (out_features, in_features)."""
    params = []
    for i in range(len(layers) - 1):
        key, sub = jax.random.split(key)
        fan_in, fan_out = layers[i], layers[i + 1]
        std = (2.0 / (fan_in + fan_out)) ** 0.5
        w = std * jax.random.normal(sub, (fan_out, fan_in), dtype=jnp.float32)
        b = jnp.zeros((fan_out,), dtype=jnp.float32)
        params.append((w, b))
    return params


def select_applied_layers(all_params):
    """Replicates FCN.forward layer selection:
    linears[0 .. N-3] with tanh, then linears[N-1]; linears[N-2] is skipped."""
    n = len(all_params)
    hidden = [all_params[i] for i in range(n - 2)]
    return hidden + [all_params[-1]]


if __name__ == "__main__":
    # Typical PINN FCN spec: 2 inputs (x, t) -> hidden -> 1 output.
    layers = [2, 32, 32, 32, 1]
    key = jax.random.PRNGKey(0)
    key, pkey, xkey, bkey = jax.random.split(key, 4)

    all_params = init_fcn_params(layers, pkey)
    # Perturb the (zero-initialized) biases slightly purely so the
    # bias-broadcast path is numerically exercised by the check below.
    all_params = [
        (w, 0.01 * jax.random.normal(jax.random.fold_in(bkey, i), b.shape,
                                     dtype=jnp.float32))
        for i, (w, b) in enumerate(all_params)
    ]
    applied_params = select_applied_layers(all_params)

    batch = 1000  # exercises padding (-> 1024) and a 2-step batch grid
    x = jax.random.normal(xkey, (batch, layers[0]), dtype=jnp.float32)

    out = fcn_forward(x, applied_params)
    out = jax.block_until_ready(out)

    # Pure-JAX reference (same semantics as FCN.forward).
    a = x
    for w, b in applied_params[:-1]:
        a = jnp.tanh(a @ w.T + b)
    w, b = applied_params[-1]
    ref = a @ w.T + b

    assert out.shape == (batch, layers[-1])
    assert jnp.allclose(out, ref, atol=1e-4, rtol=1e-4)

    # TODO(synk): lossBC / lossPDE / closure involve autograd + optimizer
    # state (training machinery), not part of the forward-pass kernel.
    print("KERNEL_OK")
</pallas_src>

<mosaic_0001>
module attributes {stable_mosaic.version = 11 : i64} {
  func.func @_mlp_kernel(%arg0: i32, %arg1: memref<2x512xf32, #tpu.memory_space<vmem>>, %arg2: memref<32x2xf32, #tpu.memory_space<vmem>>, %arg3: memref<32x1xf32, #tpu.memory_space<vmem>>, %arg4: memref<32x32xf32, #tpu.memory_space<vmem>>, %arg5: memref<32x1xf32, #tpu.memory_space<vmem>>, %arg6: memref<1x32xf32, #tpu.memory_space<vmem>>, %arg7: memref<1x1xf32, #tpu.memory_space<vmem>>, %arg8: memref<1x512xf32, #tpu.memory_space<vmem>>) attributes {dimension_semantics = [#tpu.dimension_semantics<parallel>], iteration_bounds = array<i64: 2>, scalar_prefetch = 0 : i64, scratch_operands = 0 : i64, tpu.core_type = #tpu.core_type<tc>, window_params = [{transform_indices = @transform_0, window_bounds = array<i64: 2, 512>}, {pipeline_mode = #tpu.pipeline_mode<synchronous>, transform_indices = @transform_1, window_bounds = array<i64: 32, 2>}, {pipeline_mode = #tpu.pipeline_mode<synchronous>, transform_indices = @transform_2, window_bounds = array<i64: 32, 1>}, {pipeline_mode = #tpu.pipeline_mode<synchronous>, transform_indices = @transform_3, window_bounds = array<i64: 32, 32>}, {pipeline_mode = #tpu.pipeline_mode<synchronous>, transform_indices = @transform_4, window_bounds = array<i64: 32, 1>}, {pipeline_mode = #tpu.pipeline_mode<synchronous>, transform_indices = @transform_5, window_bounds = array<i64: 1, 32>}, {pipeline_mode = #tpu.pipeline_mode<synchronous>, transform_indices = @transform_6, window_bounds = array<i64: 1, 1>}, {transform_indices = @transform_7, window_bounds = array<i64: 1, 512>}]} {
    %c0 = arith.constant 0 : index
    %c0_0 = arith.constant 0 : index
    %0 = vector.load %arg1[%c0, %c0_0] : memref<2x512xf32, #tpu.memory_space<vmem>>, vector<2x512xf32>
    %c0_1 = arith.constant 0 : index
    %c0_2 = arith.constant 0 : index
    %1 = vector.load %arg2[%c0_1, %c0_2] : memref<32x2xf32, #tpu.memory_space<vmem>>, vector<32x2xf32>
    %c0_3 = arith.constant 0 : index
    %c0_4 = arith.constant 0 : index
    %2 = vector.load %arg3[%c0_3, %c0_4] : memref<32x1xf32, #tpu.memory_space<vmem>>, vector<32x1xf32>
    %3 = vector.extract_strided_slice %1 {offsets = [0, 0], sizes = [32, 1], strides = [1, 1]} : vector<32x2xf32> to vector<32x1xf32>
    %4 = vector.extract_strided_slice %0 {offsets = [0, 0], sizes = [1, 512], strides = [1, 1]} : vector<2x512xf32> to vector<1x512xf32>
    %5 = vector.broadcast %3 : vector<32x1xf32> to vector<32x512xf32>
    %6 = vector.broadcast %4 : vector<1x512xf32> to vector<32x512xf32>
    %7 = arith.mulf %5, %6 : vector<32x512xf32>
    %8 = vector.broadcast %2 : vector<32x1xf32> to vector<32x512xf32>
    %9 = arith.addf %8, %7 : vector<32x512xf32>
    %10 = vector.extract_strided_slice %1 {offsets = [0, 1], sizes = [32, 1], strides = [1, 1]} : vector<32x2xf32> to vector<32x1xf32>
    %11 = vector.extract_strided_slice %0 {offsets = [1, 0], sizes = [1, 512], strides = [1, 1]} : vector<2x512xf32> to vector<1x512xf32>
    %12 = vector.broadcast %10 : vector<32x1xf32> to vector<32x512xf32>
    %13 = vector.broadcast %11 : vector<1x512xf32> to vector<32x512xf32>
    %14 = arith.mulf %12, %13 : vector<32x512xf32>
    %15 = arith.addf %9, %14 : vector<32x512xf32>
    %16 = math.tanh %15 : vector<32x512xf32>
    %c0_5 = arith.constant 0 : index
    %c0_6 = arith.constant 0 : index
    %17 = vector.load %arg4[%c0_5, %c0_6] : memref<32x32xf32, #tpu.memory_space<vmem>>, vector<32x32xf32>
    %c0_7 = arith.constant 0 : index
    %c0_8 = arith.constant 0 : index
    %18 = vector.load %arg5[%c0_7, %c0_8] : memref<32x1xf32, #tpu.memory_space<vmem>>, vector<32x1xf32>
    %cst = arith.constant dense<0.000000e+00> : vector<32x512xf32>
    %19 = tpu.matmul %17, %16, %cst {dimension_numbers = #tpu.dot_dimension_numbers<[1], [0], [0], [1], [0, 0, 1, 1], [], []>} : vector<32x32xf32>, vector<32x512xf32>, vector<32x512xf32> -> vector<32x512xf32>
    %20 = vector.broadcast %18 : vector<32x1xf32> to vector<32x512xf32>
    %21 = arith.addf %19, %20 : vector<32x512xf32>
    %22 = math.tanh %21 : vector<32x512xf32>
    %c0_9 = arith.constant 0 : index
    %c0_10 = arith.constant 0 : index
    %23 = vector.load %arg6[%c0_9, %c0_10] : memref<1x32xf32, #tpu.memory_space<vmem>>, vector<1x32xf32>
    %c0_11 = arith.constant 0 : index
    %c0_12 = arith.constant 0 : index
    %24 = vector.load %arg7[%c0_11, %c0_12] : memref<1x1xf32, #tpu.memory_space<vmem>>, vector<1x1xf32>
    %cst_13 = arith.constant dense<0.000000e+00> : vector<1x512xf32>
    %25 = tpu.matmul %23, %22, %cst_13 {dimension_numbers = #tpu.dot_dimension_numbers<[1], [0], [0], [1], [0, 0, 1, 1], [], []>} : vector<1x32xf32>, vector<32x512xf32>, vector<1x512xf32> -> vector<1x512xf32>
    %26 = vector.broadcast %24 : vector<1x1xf32> to vector<1x512xf32>
    %27 = arith.addf %25, %26 : vector<1x512xf32>
    %c0_14 = arith.constant 0 : index
    %c0_15 = arith.constant 0 : index
    %28 = vector.load %arg8[%c0_14, %c0_15] : memref<1x512xf32, #tpu.memory_space<vmem>>, vector<1x512xf32>
    tpu.vector_store %arg8[%c0_14, %c0_15], %27 {strides = array<i32>} : memref<1x512xf32, #tpu.memory_space<vmem>>, vector<1x512xf32>,
    return
  }
  func.func @transform_0(%arg0: i32) -> (i32, i32) {
    %c0_i32 = arith.constant 0 : i32
    %c0_i32_0 = arith.constant 0 : i32
    return %c0_i32, %arg0 : i32, i32
  }
  func.func @transform_1(%arg0: i32) -> (i32, i32) {
    %c0_i32 = arith.constant 0 : i32
    %c0_i32_0 = arith.constant 0 : i32
    %c0_i32_1 = arith.constant 0 : i32
    return %c0_i32, %c0_i32_0 : i32, i32
  }
  func.func @transform_2(%arg0: i32) -> (i32, i32) {
    %c0_i32 = arith.constant 0 : i32
    %c0_i32_0 = arith.constant 0 : i32
    %c0_i32_1 = arith.constant 0 : i32
    return %c0_i32, %c0_i32_0 : i32, i32
  }
  func.func @transform_3(%arg0: i32) -> (i32, i32) {
    %c0_i32 = arith.constant 0 : i32
    %c0_i32_0 = arith.constant 0 : i32
    %c0_i32_1 = arith.constant 0 : i32
    return %c0_i32, %c0_i32_0 : i32, i32
  }
  func.func @transform_4(%arg0: i32) -> (i32, i32) {
    %c0_i32 = arith.constant 0 : i32
    %c0_i32_0 = arith.constant 0 : i32
    %c0_i32_1 = arith.constant 0 : i32
    return %c0_i32, %c0_i32_0 : i32, i32
  }
  func.func @transform_5(%arg0: i32) -> (i32, i32) {
    %c0_i32 = arith.constant 0 : i32
    %c0_i32_0 = arith.constant 0 : i32
    %c0_i32_1 = arith.constant 0 : i32
    return %c0_i32, %c0_i32_0 : i32, i32
  }
  func.func @transform_6(%arg0: i32) -> (i32, i32) {
    %c0_i32 = arith.constant 0 : i32
    %c0_i32_0 = arith.constant 0 : i32
    %c0_i32_1 = arith.constant 0 : i32
    return %c0_i32, %c0_i32_0 : i32, i32
  }
  func.func @transform_7(%arg0: i32) -> (i32, i32) {
    %c0_i32 = arith.constant 0 : i32
    %c0_i32_0 = arith.constant 0 : i32
    return %c0_i32, %arg0 : i32, i32
  }
}

</mosaic_0001>

<bundles_post_ra>
// kernel: tpu_custom_call.1
= control target key start
LH: loop header
LB: loop body
LE: loop exit
PB: predicated region body
PF: predicated region fallthrough
CT: control target
= control target key end

     0   :  { %s1520_s0 = inlined_call_operand.vmem [shape: f32[2,1024], index: 0, kind: input, shape index: {}]   ;;  %s1521_s1 = inlined_call_operand.vmem [shape: f32[32,2], index: 1, kind: input, shape index: {}]   ;;  %s1522_s2 = inlined_call_operand.vmem [shape: f32[32,1], index: 2, kind: input, shape index: {}]   ;;  %s1523_s3 = inlined_call_operand.vmem [shape: f32[32,32], index: 3, kind: input, shape index: {}]   ;;  %s1524_s4 = inlined_call_operand.vmem [shape: f32[32,1], index: 4, kind: input, shape index: {}]   ;;  %s1525_s5 = inlined_call_operand.vmem [shape: f32[1,32], index: 5, kind: input, shape index: {}]   ;;  %s1526_s6 = inlined_call_operand.<no memory space> [shape: f32[1,1], index: 6, kind: input, shape index: {}]   ;;  %s1527_s7 = inlined_call_operand.hbm [shape: f32[1,1024], index: 7, kind: output, shape index: {}]  }
   0x1   :  { %v12_v0 = vstv %s1526_s6 }
   0x2   :  { %13 = vst [vmem:[#allocation2] sm:$0x1] %v12_v0 }
   0x3   :  { %14 = vsyncpa [#allocation4], 0 }
   0x4   :  { %16 = vsyncpa [#allocation4 + $0x1], 0  ;;  %s1281_s26 = smov 0   ;;  %s1283_s27 = smov 0  }
   0x5   :  { %s1285_s28 = smov 0   ;;  %s1287_s29 = smov 0  }
   0x6 LB: > { %s1302_s6 = sadd.s32 4294967295, %s1231_s29   ;;  %s999_s30 = sadd.s32 4294967294, %s1231_s29   ;;  %s1231_s29 = sphi %s1287_s29, %s1533_s29   ;;  %s1227_s28 = sphi %s1285_s28, %s1532_s28   ;;  %s1223_s27 = sphi %s1283_s27, %s1531_s27   ;;  %s1219_s26 = sphi %s1281_s26, %s1530_s26  }
   0x7   : > { %s1306_s8 = sadd.s32 1, %s1231_s29   ;;  %s181_s9 = sadd.s32 1, %s1227_s28 }
   0x8   : > { %s178_s10 = ssub.s32 %s1231_s29, %s1306_s8  ;;  %p191_p0 = scmp.ne.s32.totalorder %s1227_s28, %s1223_s27 }
   0x9   : > { %p179_p1 = scmp.eq.s32.totalorder %s178_s10, 0  ;;  %p192_p2 = scmp.eq.s32.totalorder %s1302_s6, 1 }
   0xa   : > { %p197_p3 = scmp.ne.s32.totalorder %s1223_s27, %s1219_s26  ;;  %p198_p4 = scmp.eq.s32.totalorder %s999_s30, 1 }
   0xb   : > { %s1317_s11 = scalar_select %p179_p1, %s1227_s28, %s181_s9  }
   0xc   : > { %p1319_p5 = por %p192_p2, %p191_p0  ;;  %p1323_p6 = por %p198_p4, %p197_p3 }
   0xd   : > { %p1002_p7 = scmp.ge.s32.totalorder %s1231_s29, 1  ;;  %p243_p8 = scmp.lt.s32.totalorder %s1231_s29, 3 }
   0xf   : > { %p244_p9 = pnand %p1002_p7, %p243_p8 }
  0x10   : > { %v287_v1 = vld [vmem:[%s1522_s2] sm:$0xff] (!%p244_p9)  ;;  %v1233_v3 = vmov (!%p244_p9), 0   ;;  %v288_v4 = vld [vmem:[%s1522_s2 + $0x8] sm:$0xff] (!%p244_p9)  ;;  %v286_v6 = vld [vmem:[%s1521_s1 + $0x18] sm:$0xff] (!%p244_p9)  ;;  %v1234_v7 = vmov (!%p244_p9), 1   ;;  %v1235_v11 = vmov (!%p244_p9), 0.0   ;;  %v312_v17 = vlaneseq (!%p244_p9) }
  0x11   : > { %247 = sbr.rel (%p244_p9) target bundleno = 678 (0x2a6), region = 48  ;;  %v283_v2 = vld [vmem:[%s1521_s1] sm:$0xff] (!%p244_p9)  ;;  %1098 = vset.pattern.permute.xlu1 (!%p244_p9), %v1233_v3  ;;  %1097 = vset.pattern.permute.xlu0 (!%p244_p9), %v1233_v3  ;;  %v284_v5 = vld [vmem:[%s1521_s1 + $0x8] sm:$0xff] (!%p244_p9)  ;;  %v285_v8 = vld [vmem:[%s1521_s1 + $0x10] sm:$0xff] (!%p244_p9)  ;;  %s1004_s23 = sshll.u32 (!%p244_p9), %s1302_s6, 2  ;;  %vm528_vm0 = vcmask (!%p244_p9), 261120  }
  0x12   : > { %366 = vperm.xlu1 (!%p244_p9), %1098, %v287_v1   ;;  %293 = vperm.xlu0 (!%p244_p9), %1097, %v283_v2   ;;  %v289_v9 = vld [vmem:[%s1522_s2 + $0x10] sm:$0xff] (!%p244_p9)  ;;  %v290_v10 = vld [vmem:[%s1522_s2 + $0x18] sm:$0xff] (!%p244_p9)  ;;  %v504_v12 = vld [vmem:[%s1524_s4] sm:$0xff] (!%p244_p9)  ;;  %p276_p10 = scmp.lt.s32.totalorder (!%p244_p9), %s1004_s23, 7  ;;  %v1369_v18 = vshrl.u32 (!%p244_p9), %v312_v17, 7  ;;  %s1021_s25 = sshll.u32 (!%p244_p9), %s1302_s6, 6 }
  0x13   : > { %605 = vmatprep.mubr.f32.mxu0 (!%p244_p9), %v1235_v11  ;;  %694 = vmatprep.mubr.f32.mxu1 (!%p244_p9), %v1235_v11  ;;  %v505_v13 = vld [vmem:[%s1524_s4 + $0x8] sm:$0xff] (!%p244_p9)  ;;  %v506_v14 = vld [vmem:[%s1524_s4 + $0x10] sm:$0xff] (!%p244_p9)  ;;  %v736_v15 = vld [vmem:[#allocation2] sm:$0x1] (!%p244_p9)  ;;  %vm922_vm1 = vcmp.lt.s32.totalorder (!%p244_p9), %v312_v17, 512  ;;  %s1478_s15 = scalar_lea.hbm (!%p244_p9), %s1527_s7, %s1021_s25  ;;  %s1237_s6 = smov (!%p244_p9), [#allocation3]  }
  0x14   : > { %v507_v16 = vld [vmem:[%s1524_s4 + $0x18] sm:$0xff] (!%p244_p9)  ;;  %v1375_v19 = vsub.s32 (!%p244_p9), 0, %v1369_v18  ;;  %v318_v20 = vsub.s32 (!%p244_p9), 2, %v1369_v18  ;;  %v322_v21 = vsub.s32 (!%p244_p9), 4, %v1369_v18  ;;  %v326_v23 = vsub.s32 (!%p244_p9), 6, %v1369_v18  ;;  %s1173_s18 = sshll.u32 (!%p244_p9), %s1237_s6, 4  ;;  %s1174_s18 = int_to_ptr.vmem [resolvable:$false] %s1173_s18 }
  0x15   : > { %v418_v24 = vsub.s32 (!%p244_p9), 1, %v1369_v18  ;;  %v422_v25 = vsub.s32 (!%p244_p9), 3, %v1369_v18  ;;  %v426_v26 = vsub.s32 (!%p244_p9), 5, %v1369_v18  ;;  %v430_v27 = vsub.s32 (!%p244_p9), 7, %v1369_v18  ;;  %s1175_s19 = scalar_lea.vmem (!%p244_p9), %s1174_s18, 128 }
  0x16   : > { %371 = vperm.xlu1 (!%p244_p9), %1098, %v288_v4   ;;  %298 = vperm.xlu0 (!%p244_p9), %1097, %v284_v5  }
  0x18   : > { %s1535_s23 = smov (!%p276_p10, %s1004_s23), 7 }
  0x19   : > { %s1005_s24 = sshll.u32 %s1535_s23, 1  ;;  %s272_s23 = sand.u32 1, %s1223_s27  }
  0x1a   : > { %1099 = vset.pattern.permute.xlu1 %v1234_v7  ;;  %308 = vperm.xlu0 %1097, %v286_v6   ;;  %s279_s9 = scalar_lea.vmem %s1520_s0, %s1005_s24  ;;  %s1003_s24 = sshll.u32 %s272_s23, 2 }
  0x1b   : > { %405 = vperm.xlu1 %1099, %v284_v5   ;;  %v282_v22 = vld [vmem:[%s279_s9] sm:$0xff]  ;;  %s274_s30 = scalar_lea.vmem [#allocation3], %s1003_s24  ;;  %s926_s16 = scalar_lea.sflag [#allocation4], %s272_s23 }
  0x1c   : > { %v315_v28 = vrot.slane %v282_v22, %v1375_v19  ;;  %v319_v29 = vrot.slane %v282_v22, %v318_v20  ;;  %v323_v30 = vrot.slane %v282_v22, %v322_v21  ;;  %v327_v33 = vrot.slane %v282_v22, %v326_v23  ;;  %s940_s9 = sshll.u32 %s274_s30, 4  ;;  %s1480_s9 = int_to_ptr.vmem [resolvable:$true] %s940_s9 }
  0x1d   : > { %v419_v34 = vrot.slane %v282_v22, %v418_v24  ;;  %v423_v35 = vrot.slane %v282_v22, %v422_v25  ;;  %v427_v36 = vrot.slane %v282_v22, %v426_v26  ;;  %v431_v37 = vrot.slane %v282_v22, %v430_v27  ;;  %s1169_s17 = scalar_lea.vmem %s1480_s9, 64  ;;  %p1176_p0 = scmp.lt.s32.totalorder %s1480_s9, %s1174_s18 }
  0x1e   : > { %1101 = vset.pattern.permute.xlu0 %v1234_v7  ;;  %v1386_v38 = vrot.slane %v315_v28, %v1375_v19  ;;  %v1389_v39 = vrot.slane %v319_v29, %v1375_v19  ;;  %v1392_v40 = vrot.slane %v323_v30, %v1375_v19  ;;  %v1395_v43 = vrot.slane %v327_v33, %v1375_v19  ;;  %p1170_p11 = scmp.ne.s32.totalorder %s1480_s9, %s1169_s17  ;;  %p1177_p1 = scmp.lt.s32.totalorder %s1175_s19, %s1169_s17 }
  0x1f   : > { %1100 = vset.pattern.permute.xlu1 %v1233_v3  ;;  %401 = vperm.xlu0 %1101, %v283_v2   ;;  %v1400_v47 = vrot.slane %v419_v34, %v418_v24  ;;  %v1402_v48 = vrot.slane %v423_v35, %v418_v24  ;;  %v1404_v49 = vrot.slane %v427_v36, %v418_v24 }
  0x20   : > { %303 = vperm.xlu1 %1100, %v285_v8   ;;  %v1406_v50 = vrot.slane %v431_v37, %v418_v24  ;;  %p1171_p12 = pnand %p1170_p11, %p1319_p5  ;;  %p1178_p2 = por %p1177_p1, %p1176_p0 }
  0x22   : > { %p1172_p13 = pneg %p1171_p12 }
  0x23   : > { %409 = vperm.xlu0 %1101, %v285_v8  }
  0x24   : > { %376 = vperm.xlu1 %1100, %v289_v9   ;;  %p1179_p3 = pnand %p1178_p2, %p1172_p13 }
  0x27   : > { %1104 = vset.pattern.permute.xlu0 %v1233_v3 }
  0x28   : > { %381 = vperm.xlu1 %1100, %v290_v10   ;;  %515 = vperm.xlu0 %1104, %v505_v13  }
  0x2c   : > { %1102 = vset.pattern.permute.xlu1 %v1234_v7  ;;  %739 = vperm.xlu0 %1104, %v736_v15  }
  0x2d   : > { %413 = vperm.xlu1 %1102, %v286_v6  }
  0x31   : > { %1103 = vset.pattern.permute.xlu1 %v1233_v3 }
  0x32   : > { %510 = vperm.xlu1 %1103, %v504_v12  }
  0x36   : > { %520 = vperm.xlu1 %1103, %v506_v14  }
  0x3a   : > { %525 = vperm.xlu1 %1103, %v507_v16  }
  0x91   : > { %v367_v31 = vpop.permute.xlu1 %366  ;;  %v294_v32 = vpop.permute.xlu0 %293 }
  0x92   : > { %v348_v52 = vmul.f32 %v1386_v38, %v294_v32  ;;  %v349_v53 = vmul.f32 %v1389_v39, %v294_v32  ;;  %v350_v55 = vmul.f32 %v1392_v40, %v294_v32  ;;  %v351_v0 = vmul.f32 %v1395_v43, %v294_v32 }
  0x94   : > { %v384_v5 = vadd.f32 %v367_v31, %v348_v52  ;;  %v385_v6 = vadd.f32 %v367_v31, %v349_v53  ;;  %v386_v7 = vadd.f32 %v367_v31, %v350_v55  ;;  %v387_v15 = vadd.f32 %v367_v31, %v351_v0 }
  0x95   : > { %v372_v41 = vpop.permute.xlu1 %371  ;;  %v299_v42 = vpop.permute.xlu0 %298 }
  0x96   : > { %v352_v44 = vmul.f32 %v1386_v38, %v299_v42  ;;  %v353_v45 = vmul.f32 %v1389_v39, %v299_v42  ;;  %v354_v46 = vmul.f32 %v1392_v40, %v299_v42  ;;  %v355_v51 = vmul.f32 %v1395_v43, %v299_v42 }
  0x98   : > { %v388_v56 = vadd.f32 %v372_v41, %v352_v44  ;;  %v389_v57 = vadd.f32 %v372_v41, %v353_v45  ;;  %v390_v58 = vadd.f32 %v372_v41, %v354_v46  ;;  %v391_v1 = vadd.f32 %v372_v41, %v355_v51 }
  0x99   : > { %v309_v54 = vpop.permute.xlu0 %308 }
  0x9a   : > { %v406_v59 = vpop.permute.xlu1 %405  ;;  %v360_v51 = vmul.f32 %v1386_v38, %v309_v54  ;;  %v361_v52 = vmul.f32 %v1389_v39, %v309_v54  ;;  %v362_v53 = vmul.f32 %v1392_v40, %v309_v54 }
  0x9b   : > { %v456_v60 = vmul.f32 %v1400_v47, %v406_v59  ;;  %v457_v61 = vmul.f32 %v1402_v48, %v406_v59  ;;  %v458_v62 = vmul.f32 %v1404_v49, %v406_v59  ;;  %v459_v63 = vmul.f32 %v1406_v50, %v406_v59 }
  0x9d   : > { %v472_v2 = vadd.f32 %v456_v60, %v388_v56  ;;  %v473_v3 = vadd.f32 %v457_v61, %v389_v57  ;;  %v474_v4 = vadd.f32 %v458_v62, %v390_v58  ;;  %v475_v8 = vadd.f32 %v459_v63, %v391_v1 }
  0x9e   : > { %v402_v9 = vpop.permute.xlu0 %401  ;;  %v363_v57 = vmul.f32 %v1395_v43, %v309_v54 }
  0x9f   : > { %1105 = vtanh.f32 %v472_v2  ;;  %v452_v10 = vmul.f32 %v1400_v47, %v402_v9  ;;  %v453_v12 = vmul.f32 %v1402_v48, %v402_v9  ;;  %v454_v13 = vmul.f32 %v1404_v49, %v402_v9  ;;  %v304_v14 = vpop.permute.xlu1 %303 }
  0xa0   : > { %1107 = vtanh.f32 %v473_v3  ;;  %v455_v16 = vmul.f32 %v1406_v50, %v402_v9  ;;  %v356_v24 = vmul.f32 %v1386_v38, %v304_v14  ;;  %v357_v25 = vmul.f32 %v1389_v39, %v304_v14 }
  0xa1   : > { %1109 = vtanh.f32 %v474_v4  ;;  %v468_v20 = vadd.f32 %v452_v10, %v384_v5  ;;  %v469_v21 = vadd.f32 %v453_v12, %v385_v6  ;;  %v470_v22 = vadd.f32 %v454_v13, %v386_v7 }
  0xa2   : > { %1111 = vtanh.f32 %v475_v8  ;;  %v471_v23 = vadd.f32 %v455_v16, %v387_v15  ;;  %v410_v26 = vpop.permute.xlu0 %409  ;;  %v358_v27 = vmul.f32 %v1392_v40, %v304_v14  ;;  %v359_v33 = vmul.f32 %v1395_v43, %v304_v14 }
  0xa3   : > { %1113 = vtanh.f32 %v468_v20  ;;  %v377_v28 = vpop.permute.xlu1 %376  ;;  %v460_v29 = vmul.f32 %v1400_v47, %v410_v26  ;;  %v461_v32 = vmul.f32 %v1402_v48, %v410_v26  ;;  %v462_v35 = vmul.f32 %v1404_v49, %v410_v26 }
  0xa4   : > { %1115 = vtanh.f32 %v469_v21  ;;  %v392_v30 = vadd.f32 %v377_v28, %v356_v24  ;;  %v393_v31 = vadd.f32 %v377_v28, %v357_v25  ;;  %v394_v34 = vadd.f32 %v377_v28, %v358_v27  ;;  %v500_v24 = vld [vmem:[%s1523_s3] sm:$0xff]  ;;  %v501_v25 = vld [vmem:[%s1523_s3 + $0x8] sm:$0xff]  ;;  %v503_v27 = vld [vmem:[%s1523_s3 + $0x18] sm:$0xff] }
  0xa5   : > { %1117 = vtanh.f32 %v470_v22  ;;  %v395_v36 = vadd.f32 %v377_v28, %v359_v33  ;;  %v463_v37 = vmul.f32 %v1406_v50, %v410_v26  ;;  %v502_v26 = vld [vmem:[%s1523_s3 + $0x10] sm:$0xff] }
  0xa6   : > { %1119 = vtanh.f32 %v471_v23  ;;  %v476_v41 = vadd.f32 %v460_v29, %v392_v30  ;;  %v477_v44 = vadd.f32 %v461_v32, %v393_v31  ;;  %v478_v55 = vadd.f32 %v462_v35, %v394_v34 }
  0xa7   : > { %v382_v42 = vpop.permute.xlu1 %381  ;;  %v479_v58 = vadd.f32 %v463_v37, %v395_v36  ;;  %v516_v33 = vpop.permute.xlu0 %515 }
  0xa8   : > { %1121 = vtanh.f32 %v476_v41  ;;  %v396_v60 = vadd.f32 %v382_v42, %v360_v51  ;;  %v397_v61 = vadd.f32 %v382_v42, %v361_v52  ;;  %v398_v62 = vadd.f32 %v382_v42, %v362_v53 }
  0xa9   : > { %v1106_v45 = vpop.eup %1105  ;;  %1123 = vtanh.f32 %v477_v44  ;;  %v399_v43 = vadd.f32 %v382_v42, %v363_v57 }
  0xaa   : > { %v1108_v46 = vpop.eup %1107  ;;  %1125 = vtanh.f32 %v478_v55 }
  0xab   : > { %v1110_v56 = vpop.eup %1109  ;;  %1127 = vtanh.f32 %v479_v58 }
  0xac   : > { %v1112_v59 = vpop.eup %1111  ;;  %v414_v63 = vpop.permute.xlu1 %413 }
  0xad   : > { %v1114_v0 = vpop.eup %1113  ;;  %v464_v1 = vmul.f32 %v1400_v47, %v414_v63  ;;  %v465_v38 = vmul.f32 %v1402_v48, %v414_v63  ;;  %v466_v39 = vmul.f32 %v1404_v49, %v414_v63  ;;  %v467_v40 = vmul.f32 %v1406_v50, %v414_v63 }
  0xae   : > { %v1116_v2 = vpop.eup %1115  ;;  %v1024_v6 = vpack.c.bf16 %v1106_v45, %v1114_v0 }
  0xaf   : > { %v1118_v54 = vpop.eup %1117  ;;  %v480_v3 = vadd.f32 %v464_v1, %v396_v60  ;;  %v481_v4 = vadd.f32 %v465_v38, %v397_v61  ;;  %v482_v5 = vadd.f32 %v466_v39, %v398_v62  ;;  %v483_v8 = vadd.f32 %v467_v40, %v399_v43 }
  0xb0   : > { %v1120_v7 = vpop.eup %1119  ;;  %v1022_v9 = vpack.c.bf16 %v1108_v46, %v1116_v2  ;;  %v1032_v10 = vpack.c.bf16 %v1110_v56, %v1118_v54 }
  0xb1   : > { %1129 = vtanh.f32 %v480_v3  ;;  %v1030_v47 = vpack.c.bf16 %v1112_v59, %v1120_v7  ;;  %v511_v28 = vpop.permute.xlu1 %510 }
  0xb2   : > { %1131 = vtanh.f32 %v481_v4  ;;  %1023 = vmatprep.subr.bf16.mxu0 %v1022_v9  ;;  %v1122_v48 = vpop.eup %1121 }
  0xb3   : > { %1133 = vtanh.f32 %v482_v5  ;;  %1031 = vmatprep.subr.bf16.mxu1 %v1030_v47  ;;  %1025 = vmatpush1.bf16.msra.mxu0 %v1024_v6  ;;  %v1124_v49 = vpop.eup %1123 }
  0xb4   : > { %1135 = vtanh.f32 %v483_v8  ;;  %1033 = vmatpush1.bf16.msra.mxu1 %v1032_v10  ;;  %v1126_v50 = vpop.eup %1125 }
  0xb5   : > { %v1128_v12 = vpop.eup %1127  ;;  %v521_v45 = vpop.permute.xlu1 %520 }
  0xb9   : > { %v526_v62 = vpop.permute.xlu1 %525 }
  0xbb   : > { %v1130_v13 = vpop.eup %1129 }
  0xbc   : > { %v1132_v14 = vpop.eup %1131  ;;  %v1028_v15 = vpack.c.bf16 %v1130_v13, %v1122_v48 }
  0xbd   : > { %v1134_v16 = vpop.eup %1133  ;;  %v1026_v20 = vpack.c.bf16 %v1132_v14, %v1124_v49 }
  0xbe   : > { %v1136_v21 = vpop.eup %1135  ;;  %v1036_v22 = vpack.c.bf16 %v1134_v16, %v1126_v50 }
  0xbf   : > { %1027 = vmatprep.subr.bf16.mxu0 %v1026_v20  ;;  %v1034_v23 = vpack.c.bf16 %v1136_v21, %v1128_v12 }
  0xc0   : > { %1029 = vmatpush1.bf16.msra.mxu0 %v1028_v15 }
  0xc1   : > { %1035 = vmatprep.subr.bf16.mxu1 %v1034_v23 }
  0xc2   : > { %1037 = vmatpush1.bf16.msra.mxu1 %v1036_v22 }
  0xc3   : > { %1006 = vmatmul.mubr.msk.f32.vlgmr.msra.gmra.mrb[0].mxu0 %vm528_vm0, %v500_v24 }
  0xc4   : > { %611 = vmatprep.mubr.f32.mxu0 %v1235_v11 }
  0xc5   : > { %1010 = vmatmul.mubr.msk.f32.vlgmr.msra.gmra.mrb[0].mxu1 %vm528_vm0, %v500_v24 }
  0xc6   : > { %700 = vmatprep.mubr.f32.mxu1 %v1235_v11 }
  0xc7   : > { %1007 = vmatmul.mubr.msk.f32.gmra.mrb[2].mxu0 %vm528_vm0, %v501_v25 }
  0xc8   : > { %617 = vmatprep.mubr.f32.mxu0 %v1235_v11 }
  0xc9   : > { %1011 = vmatmul.mubr.msk.f32.gmra.mrb[2].mxu1 %vm528_vm0, %v501_v25 }
  0xca   : > { %706 = vmatprep.mubr.f32.mxu1 %v1235_v11 }
  0xcb   : > { %1008 = vmatmul.mubr.msk.f32.gmra.mrb[4].mxu0 %vm528_vm0, %v502_v26 }
  0xcc   : > { %623 = vmatprep.mubr.f32.mxu0 %v1235_v11 }
  0xcd   : > { %1012 = vmatmul.mubr.msk.f32.gmra.mrb[4].mxu1 %vm528_vm0, %v502_v26 }
  0xce   : > { %712 = vmatprep.mubr.f32.mxu1 %v1235_v11 }
  0xcf   : > { %1009 = vmatmul.mubr.msk.f32.gmra.mrb[6].mxu0 %vm528_vm0, %v503_v27 }
  0xd0   : > { %813 = vmatprep.mubr.f32.mxu0 %v1235_v11 }
  0xd1   : > { %1013 = vmatmul.mubr.msk.f32.gmra.mrb[6].mxu1 %vm528_vm0, %v503_v27  ;;  %v735_v27 = vld [vmem:[%s1525_s5] sm:$0x1] }
  0xd2   : > { %884 = vmatprep.mubr.f32.mxu1 %v1235_v11 }
 0x196   : > { %v607_v29 = vpop.f32.mrb[0].mxu0 }
 0x197   : > { %v608_v30 = vadd.f32 %v607_v29, %v511_v28  ;;  %v609_v31 = vpop.f32.mrb[1].mxu0 }
 0x198   : > { %v696_v32 = vpop.f32.mrb[0].mxu1  ;;  %v610_v34 = vadd.f32 %v609_v31, %v511_v28 }
 0x199   : > { %1137 = vtanh.f32 %v608_v30  ;;  %v697_v35 = vadd.f32 %v696_v32, %v511_v28  ;;  %v698_v36 = vpop.f32.mrb[1].mxu1  ;;  %v740_v30 = vpop.permute.xlu0 %739 }
 0x19a   : > { %1139 = vtanh.f32 %v610_v34  ;;  %v699_v37 = vadd.f32 %v698_v36, %v511_v28  ;;  %v613_v41 = vpop.f32.mrb[2].mxu0  ;;  %v1236_v28 = vmov 1966171168   ;;  %v745_v32 = vrot.slane %v740_v30, %v1375_v19 }
 0x19b   : > { %1141 = vtanh.f32 %v697_v35  ;;  %v614_v42 = vadd.f32 %v613_v41, %v516_v33  ;;  %v615_v44 = vpop.f32.mrb[3].mxu0  ;;  %v898_v29 = vunpack.c.l.s4 %v1236_v28 }
 0x19c   : > { %1143 = vtanh.f32 %v699_v37  ;;  %v702_v46 = vpop.f32.mrb[2].mxu1  ;;  %v616_v11 = vadd.f32 %v615_v44, %v516_v33 }
 0x19d   : > { %1145 = vtanh.f32 %v614_v42  ;;  %v703_v51 = vadd.f32 %v702_v46, %v516_v33  ;;  %v704_v52 = vpop.f32.mrb[3].mxu1  ;;  %v899_v31 = vunpack.c.0.s8 %v898_v29 }
 0x19e   : > { %1147 = vtanh.f32 %v616_v11  ;;  %v705_v53 = vadd.f32 %v704_v52, %v516_v33  ;;  %v619_v55 = vpop.f32.mrb[4].mxu0 }
 0x19f   : > { %1149 = vtanh.f32 %v703_v51  ;;  %v620_v56 = vadd.f32 %v619_v55, %v521_v45  ;;  %v621_v57 = vpop.f32.mrb[5].mxu0  ;;  %v902_v41 = vsub.s32 %v899_v31, %v1369_v18 }
 0x1a0   : > { %1151 = vtanh.f32 %v705_v53  ;;  %v708_v58 = vpop.f32.mrb[4].mxu1  ;;  %v622_v59 = vadd.f32 %v621_v57, %v521_v45 }
 0x1a1   : > { %1153 = vtanh.f32 %v620_v56  ;;  %v709_v60 = vadd.f32 %v708_v58, %v521_v45  ;;  %v710_v61 = vpop.f32.mrb[5].mxu1 }
 0x1a2   : > { %1155 = vtanh.f32 %v622_v59  ;;  %v711_v63 = vadd.f32 %v710_v61, %v521_v45  ;;  %v625_v0 = vpop.f32.mrb[6].mxu0 }
 0x1a3   : > { %v1138_v1 = vpop.eup %1137  ;;  %1157 = vtanh.f32 %v709_v60  ;;  %v626_v38 = vadd.f32 %v625_v0, %v526_v62  ;;  %v627_v39 = vpop.f32.mrb[7].mxu0 }
 0x1a4   : > { %v1140_v40 = vpop.eup %1139  ;;  %1159 = vtanh.f32 %v711_v63  ;;  %v714_v2 = vpop.f32.mrb[6].mxu1  ;;  %v628_v43 = vadd.f32 %v627_v39, %v526_v62 }
 0x1a5   : > { %v1142_v54 = vpop.eup %1141  ;;  %1161 = vtanh.f32 %v626_v38  ;;  %v715_v3 = vadd.f32 %v714_v2, %v526_v62  ;;  %v716_v4 = vpop.f32.mrb[7].mxu1 }
 0x1a6   : > { %v1144_v5 = vpop.eup %1143  ;;  %1163 = vtanh.f32 %v628_v43  ;;  %v717_v6 = vadd.f32 %v716_v4, %v526_v62 }
 0x1a7   : > { %v1146_v7 = vpop.eup %1145  ;;  %1165 = vtanh.f32 %v715_v3 }
 0x1a8   : > { %v1148_v8 = vpop.eup %1147  ;;  %1167 = vtanh.f32 %v717_v6  ;;  %v1040_v9 = vpack.c.bf16 %v1146_v7, %v1138_v1 }
 0x1a9   : > { %v1150_v10 = vpop.eup %1149  ;;  %v1038_v47 = vpack.c.bf16 %v1148_v8, %v1140_v40 }
 0x1aa   : > { %v1152_v48 = vpop.eup %1151  ;;  %v1048_v49 = vpack.c.bf16 %v1150_v10, %v1142_v54 }
 0x1ab   : > { %v1154_v50 = vpop.eup %1153  ;;  %1039 = vmatprep.subr.bf16.mxu0 %v1038_v47  ;;  %v1046_v12 = vpack.c.bf16 %v1152_v48, %v1144_v5 }
 0x1ac   : > { %v1156_v13 = vpop.eup %1155  ;;  %1041 = vmatpush1.bf16.msra.mxu0 %v1040_v9 }
 0x1ad   : > { %v1158_v14 = vpop.eup %1157  ;;  %1047 = vmatprep.subr.bf16.mxu1 %v1046_v12 }
 0x1ae   : > { %v1160_v15 = vpop.eup %1159  ;;  %1049 = vmatpush1.bf16.msra.mxu1 %v1048_v49 }
 0x1af   : > { %v1162_v16 = vpop.eup %1161 }
 0x1b0   : > { %v1164_v20 = vpop.eup %1163  ;;  %v1044_v21 = vpack.c.bf16 %v1162_v16, %v1154_v50 }
 0x1b1   : > { %v1166_v22 = vpop.eup %1165  ;;  %v1042_v23 = vpack.c.bf16 %v1164_v20, %v1156_v13 }
 0x1b2   : > { %v1168_v24 = vpop.eup %1167  ;;  %v1052_v25 = vpack.c.bf16 %v1166_v22, %v1158_v14 }
 0x1b3   : > { %1043 = vmatprep.subr.bf16.mxu0 %v1042_v23  ;;  %v1050_v26 = vpack.c.bf16 %v1168_v24, %v1160_v15 }
 0x1b4   : > { %1045 = vmatpush1.bf16.msra.mxu0 %v1044_v21 }
 0x1b5   : > { %1051 = vmatprep.subr.bf16.mxu1 %v1050_v26 }
 0x1b6   : > { %1053 = vmatpush1.bf16.msra.mxu1 %v1052_v25 }
 0x1b7   : > { %1014 = vmatmul.mubr.msk.f32.vlgmr.msra.gmra.mrb[8].mxu0 %vm528_vm0, %v735_v27 }
 0x1b9   : > { %1015 = vmatmul.mubr.msk.f32.vlgmr.msra.gmra.mrb[8].mxu1 %vm528_vm0, %v735_v27 }
 0x28a   : > { %v815_v33 = vpop.f32.mrb[8].mxu0 }
 0x28b   : > { %v816_v34 = vadd.f32 %v815_v33, %v745_v32  ;;  %v817_v35 = vpop.f32.mrb[9].mxu0 }
 0x28c   : > { %v886_v36 = vpop.f32.mrb[8].mxu1  ;;  %v818_v37 = vadd.f32 %v817_v35, %v745_v32 }
 0x28d   : > { %v887_v42 = vadd.f32 %v886_v36, %v745_v32  ;;  %v888_v44 = vpop.f32.mrb[9].mxu1 }
 0x28e   : > { %v895_v45 = vcombine.low %v816_v34, %v818_v37  ;;  %v889_v46 = vadd.f32 %v888_v44, %v745_v32 }
 0x290   : > { %v903_v11 = vrot.slane %v895_v45, %v902_v41  ;;  %v896_v51 = vcombine.low %v887_v42, %v889_v46 }
 0x292   : > { %v910_v52 = vrot.slane %v896_v51, %v902_v41 }
 0x294   : > { %v911_v19 = vcombine.low %v903_v11, %v910_v52 }
 0x296   : > { %v918_v53 = vrot.slane %v911_v19, %v902_v41 }
 0x298   : > { %924 = vst.msk [vmem:[%s274_s30] sm:$0xf] %vm922_vm1, %v918_v53 }
 0x299   : > { %1182 = shalt.err (!%p1179_p3)
}
 0x29a   : > { %s1183_s20 = scalar_lea.hbm %s1478_s15, 64  ;;  %s1187_s23 = scalar_lea.hbm %s1527_s7, 128 }
 0x29b   : > { %p1184_p4 = scmp.ne.s32.totalorder %s1478_s15, %s1183_s20  ;;  %p1188_p9 = scmp.lt.u32.totalorder %s1478_s15, %s1527_s7 }
 0x29c   : > { %p1189_p10 = scmp.lt.u32.totalorder %s1187_s23, %s1183_s20  ;;  %p1191_p12 = scmp.lt.u32.totalorder %s1183_s20, %s1478_s15 }
 0x29d   : > { %p1185_p7 = pnand %p1184_p4, %p1319_p5 }
 0x29e   : > { %p1190_p11 = por %p1189_p10, %p1188_p9 }
 0x29f   : > { %p1186_p8 = pneg %p1185_p7 }
 0x2a0   : > { %p1192_p13 = por %p1191_p12, %p1190_p11 }
 0x2a2   : > { %p1193_p0 = pnand %p1192_p13, %p1186_p8 }
 0x2a4   : > { %1196 = shalt.err (!%p1193_p0)
}
 0x2a5   : > { %1054 = dma.vmem_to_hbm [thread:$0]  (%p1319_p5), %s1480_s9, 64, %s1478_s15, %s926_s16  }
 0x2a6 PF: > { %p1060_p1 = scmp.ge.s32.totalorder %s1231_s29, 2  ;;  %s952_s30 = sand.u32 1, %s1219_s26  }
 0x2a7   : > { %s953_s10 = scalar_lea.sflag [#allocation4], %s952_s30 }
 0x2a8   : > { %p1057_p2 = pnand %p1060_p1, %p1323_p6 }
 0x2aa   : > { %1214 = dma.done.wait (!%p1057_p2), %s953_s10, 64  }
 0x2ab   : > { %1216 = vsyncadd (!%p1057_p2), %s953_s10, 4294967232  ;;  %p19_p3 = scmp.ge.s32.totalorder %s1306_s8, 4   ;;  %s1530_s26 = smov %s1223_s27 }
 0x2ac   : > { %s1531_s27 = smov %s1227_s28  ;;  %s1532_s28 = smov %s1317_s11 }
 0x2ad   : > { %s1533_s29 = smov %s1306_s8  ;;  %21 = sbr.rel (!%p19_p3) target bundleno = 6 (0x6), region = 83 }
 0x2b4   :  { %958 = vsyncpa [#allocation4], 1 }
 0x2b5   :  { %960 = vsyncpa [#allocation4 + $0x1], 1 }

</bundles_post_ra>
